<compile_context>
chip_gen: v7x
topology: tpu7x:2x2x1
jax: 0.10.0
libtpu: 0.0.40
codegen_flags: <defaults>
</compile_context>

<pallas_src>
import jax
import jax.numpy as jnp
from jax.experimental import pallas as pl
from jax.experimental.pallas import tpu as pltpu


def _round_up(x, m):
    return ((x + m - 1) // m) * m


def _make_embedding_kernel(TS, S_pad):
    def kernel(ids_ref, word_hbm, pos_ref, gamma_ref, beta_ref, out_ref,
               tok_buf, sem):
        # ids_ref:   (B * S_pad,) int32 in SMEM (scalar prefetch)
        # word_hbm:  (V, H) raw HBM ref (memory_space=pl.ANY)
        # pos_ref:   (S_pad, H) VMEM-resident positional table
        # gamma_ref / beta_ref: (1, H) resident affine params
        # out_ref:   (TS, H) output tile
        # tok_buf:   (TS, H) VMEM scratch for the gathered word-emb rows
        # sem:       single DMA semaphore shared by the row-gather copies
        b = pl.program_id(0)
        st = pl.program_id(1)
        base = b * S_pad + st * TS

        # Gather TS word-embedding rows: start all per-row DMAs, then wait.
        copies = []
        for r in range(TS):
            tok_id = ids_ref[base + r]
            cp = pltpu.make_async_copy(word_hbm.at[tok_id], tok_buf.at[r], sem)
            cp.start()
            copies.append(cp)
        for cp in copies:
            cp.wait()

        # Positional rows for this tile (contiguous slice of the resident table).
        pos_base = pl.multiple_of(st * TS, 8)
        pos_rows = pos_ref[pl.ds(pos_base, TS), :]

        emb = tok_buf[...].astype(jnp.float32) + pos_rows.astype(jnp.float32)

        # LayerNorm over the hidden axis (eps matches nn.LayerNorm default 1e-5),
        # computed on the whole (TS, H) tile at once.
        mean = jnp.mean(emb, axis=-1, keepdims=True)
        centered = emb - mean
        var = jnp.mean(centered * centered, axis=-1, keepdims=True)
        norm = centered * jax.lax.rsqrt(var + 1e-5)
        out = norm * gamma_ref[...].astype(jnp.float32) + beta_ref[...].astype(jnp.float32)

        # Dropout: identity in eval mode.
        # TODO(synk): training-mode dropout (pltpu.prng_*) not implemented.
        out_ref[...] = out.astype(out_ref.dtype)

    return kernel


def embedding_forward(input_ids, word_emb, pos_emb, gamma, beta, *, seq_tile=256):
    """input_ids: [B, S] int32 -> [B, S, H] float32"""
    B, S = input_ids.shape
    V, H = word_emb.shape

    # Tile of TS tokens along the sequence; TS is a multiple of 8 and divides S_pad.
    TS = min(seq_tile, _round_up(S, 8))
    S_pad = _round_up(S, TS)

    # Flatten + pad token ids (padding uses id 0, a valid row; padded rows are
    # sliced off the output).
    ids_pad = jnp.pad(input_ids.astype(jnp.int32), ((0, 0), (0, S_pad - S)))
    flat_ids = ids_pad.reshape(-1)

    # Positional table restricted to the used positions, padded to S_pad rows.
    pos_table = jnp.pad(pos_emb[:S], ((0, S_pad - S), (0, 0)))

    gamma2d = gamma.reshape(1, H)
    beta2d = beta.reshape(1, H)

    grid_spec = pltpu.PrefetchScalarGridSpec(
        num_scalar_prefetch=1,
        grid=(B, S_pad // TS),
        in_specs=[
            # word embedding table: raw HBM ref, gathered manually per row
            pl.BlockSpec(memory_space=pl.ANY),
            # positional table: VMEM-resident (constant block), sliced in-kernel
            pl.BlockSpec((S_pad, H), lambda b, s, ids: (0, 0)),
            # LayerNorm affine params: resident (1, H) blocks
            pl.BlockSpec((1, H), lambda b, s, ids: (0, 0)),
            pl.BlockSpec((1, H), lambda b, s, ids: (0, 0)),
        ],
        out_specs=pl.BlockSpec((None, TS, H), lambda b, s, ids: (b, s, 0)),
        scratch_shapes=[
            pltpu.VMEM((TS, H), word_emb.dtype),   # gathered token rows
            pltpu.SemaphoreType.DMA(()),           # shared DMA semaphore
        ],
    )

    out = pl.pallas_call(
        _make_embedding_kernel(TS, S_pad),
        out_shape=jax.ShapeDtypeStruct((B, S_pad, H), jnp.float32),
        grid_spec=grid_spec,
        compiler_params=pltpu.CompilerParams(
            dimension_semantics=("parallel", "parallel")
        ),
    )(flat_ids, word_emb, pos_table, gamma2d, beta2d)

    return out[:, :S, :]


def _reference(input_ids, word_emb, pos_emb, gamma, beta):
    tok = word_emb[input_ids]                      # [B, S, H]
    pos = pos_emb[jnp.arange(input_ids.shape[1])]  # [S, H]
    emb = tok + pos[None, :, :]
    mean = jnp.mean(emb, axis=-1, keepdims=True)
    var = jnp.mean((emb - mean) ** 2, axis=-1, keepdims=True)
    return (emb - mean) / jnp.sqrt(var + 1e-5) * gamma + beta


if __name__ == "__main__":
    vocab_size, hidden_size, max_len = 50, 128, 16
    B, S = 2, 8

    key = jax.random.PRNGKey(0)
    k_tok, k_pos, k_ids = jax.random.split(key, 3)

    # nn.Embedding default init: N(0, 1); nn.LayerNorm: gamma=1, beta=0.
    word_emb = jax.random.normal(k_tok, (vocab_size, hidden_size), jnp.float32)
    pos_emb = jax.random.normal(k_pos, (max_len, hidden_size), jnp.float32)
    gamma = jnp.ones((hidden_size,), jnp.float32)
    beta = jnp.zeros((hidden_size,), jnp.float32)

    input_ids = jax.random.randint(k_ids, (B, S), 0, vocab_size, dtype=jnp.int32)

    out = embedding_forward(input_ids, word_emb, pos_emb, gamma, beta)
    out = jax.block_until_ready(out)

    ref = _reference(input_ids, word_emb, pos_emb, gamma, beta)
    assert out.shape == (B, S, hidden_size)
    assert jnp.allclose(out, ref, atol=1e-4, rtol=1e-4), "mismatch vs reference"

    print("KERNEL_OK")
</pallas_src>

<mosaic_0001>
module attributes {stable_mosaic.version = 11 : i64} {
  func.func @kernel(%arg0: i32, %arg1: i32, %arg2: memref<16xi32, #tpu.memory_space<smem>>, %arg3: memref<50x128xf32, #tpu.memory_space<any>>, %arg4: memref<8x128xf32, #tpu.memory_space<vmem>>, %arg5: memref<1x128xf32, #tpu.memory_space<vmem>>, %arg6: memref<1x128xf32, #tpu.memory_space<vmem>>, %arg7: memref<1x8x128xf32, #tpu.memory_space<vmem>>, %arg8: memref<8x128xf32, #tpu.memory_space<vmem>>, %arg9: memref<!tpu.dma_semaphore, #tpu.memory_space<semaphore_mem>>) attributes {dimension_semantics = [#tpu.dimension_semantics<parallel>, #tpu.dimension_semantics<parallel>], iteration_bounds = array<i64: 2, 1>, scalar_prefetch = 1 : i64, scratch_operands = 2 : i64, tpu.core_type = #tpu.core_type<tc>, window_params = [{}, {pipeline_mode = #tpu.pipeline_mode<synchronous>, transform_indices = @transform_1, window_bounds = array<i64: 8, 128>}, {pipeline_mode = #tpu.pipeline_mode<synchronous>, transform_indices = @transform_2, window_bounds = array<i64: 1, 128>}, {pipeline_mode = #tpu.pipeline_mode<synchronous>, transform_indices = @transform_3, window_bounds = array<i64: 1, 128>}, {transform_indices = @transform_4, window_bounds = array<i64: 1, 8, 128>}]} {
    %c8_i32 = arith.constant 8 : i32
    %0 = arith.muli %arg0, %c8_i32 : i32
    %c8_i32_0 = arith.constant 8 : i32
    %1 = arith.muli %arg1, %c8_i32_0 : i32
    %2 = arith.addi %0, %1 : i32
    %c0_i32 = arith.constant 0 : i32
    %3 = arith.addi %2, %c0_i32 : i32
    %4 = arith.index_cast %3 : i32 to index
    %5 = memref.load %arg2[%4] : memref<16xi32, #tpu.memory_space<smem>>
    %c0_i32_1 = arith.constant 0 : i32
    %c0_i32_2 = arith.constant 0 : i32
    %6 = tpu.memref_slice %arg3[%5, %c0_i32_2] : memref<50x128xf32, #tpu.memory_space<any>> -> memref<1x128xf32, #tpu.memory_space<any>>
    %7 = tpu.memref_squeeze %6 : memref<1x128xf32, #tpu.memory_space<any>> -> memref<128xf32, #tpu.memory_space<any>>
    %c0_i32_3 = arith.constant 0 : i32
    %8 = tpu.memref_slice %arg8[%c0_i32_1, %c0_i32_3] : memref<8x128xf32, #tpu.memory_space<vmem>> -> memref<1x128xf32, #tpu.memory_space<vmem>>
    %9 = tpu.memref_squeeze %8 : memref<1x128xf32, #tpu.memory_space<vmem>> -> memref<128xf32, #tpu.memory_space<vmem>>
    tpu.enqueue_dma source(%7 : memref<128xf32, #tpu.memory_space<any>>) target(%9 : memref<128xf32, #tpu.memory_space<vmem>>) target_semaphore(%arg9 : memref<!tpu.dma_semaphore, #tpu.memory_space<semaphore_mem>>)
    %c1_i32 = arith.constant 1 : i32
    %10 = arith.addi %2, %c1_i32 : i32
    %11 = arith.index_cast %10 : i32 to index
    %12 = memref.load %arg2[%11] : memref<16xi32, #tpu.memory_space<smem>>
    %c1_i32_4 = arith.constant 1 : i32
    %c0_i32_5 = arith.constant 0 : i32
    %13 = tpu.memref_slice %arg3[%12, %c0_i32_5] : memref<50x128xf32, #tpu.memory_space<any>> -> memref<1x128xf32, #tpu.memory_space<any>>
    %14 = tpu.memref_squeeze %13 : memref<1x128xf32, #tpu.memory_space<any>> -> memref<128xf32, #tpu.memory_space<any>>
    %c0_i32_6 = arith.constant 0 : i32
    %15 = tpu.memref_slice %arg8[%c1_i32_4, %c0_i32_6] : memref<8x128xf32, #tpu.memory_space<vmem>> -> memref<1x128xf32, #tpu.memory_space<vmem>>
    %16 = tpu.memref_squeeze %15 : memref<1x128xf32, #tpu.memory_space<vmem>> -> memref<128xf32, #tpu.memory_space<vmem>>
    tpu.enqueue_dma source(%14 : memref<128xf32, #tpu.memory_space<any>>) target(%16 : memref<128xf32, #tpu.memory_space<vmem>>) target_semaphore(%arg9 : memref<!tpu.dma_semaphore, #tpu.memory_space<semaphore_mem>>)
    %c2_i32 = arith.constant 2 : i32
    %17 = arith.addi %2, %c2_i32 : i32
    %18 = arith.index_cast %17 : i32 to index
    %19 = memref.load %arg2[%18] : memref<16xi32, #tpu.memory_space<smem>>
    %c2_i32_7 = arith.constant 2 : i32
    %c0_i32_8 = arith.constant 0 : i32
    %20 = tpu.memref_slice %arg3[%19, %c0_i32_8] : memref<50x128xf32, #tpu.memory_space<any>> -> memref<1x128xf32, #tpu.memory_space<any>>
    %21 = tpu.memref_squeeze %20 : memref<1x128xf32, #tpu.memory_space<any>> -> memref<128xf32, #tpu.memory_space<any>>
    %c0_i32_9 = arith.constant 0 : i32
    %22 = tpu.memref_slice %arg8[%c2_i32_7, %c0_i32_9] : memref<8x128xf32, #tpu.memory_space<vmem>> -> memref<1x128xf32, #tpu.memory_space<vmem>>
    %23 = tpu.memref_squeeze %22 : memref<1x128xf32, #tpu.memory_space<vmem>> -> memref<128xf32, #tpu.memory_space<vmem>>
    tpu.enqueue_dma source(%21 : memref<128xf32, #tpu.memory_space<any>>) target(%23 : memref<128xf32, #tpu.memory_space<vmem>>) target_semaphore(%arg9 : memref<!tpu.dma_semaphore, #tpu.memory_space<semaphore_mem>>)
    %c3_i32 = arith.constant 3 : i32
    %24 = arith.addi %2, %c3_i32 : i32
    %25 = arith.index_cast %24 : i32 to index
    %26 = memref.load %arg2[%25] : memref<16xi32, #tpu.memory_space<smem>>
    %c3_i32_10 = arith.constant 3 : i32
    %c0_i32_11 = arith.constant 0 : i32
    %27 = tpu.memref_slice %arg3[%26, %c0_i32_11] : memref<50x128xf32, #tpu.memory_space<any>> -> memref<1x128xf32, #tpu.memory_space<any>>
    %28 = tpu.memref_squeeze %27 : memref<1x128xf32, #tpu.memory_space<any>> -> memref<128xf32, #tpu.memory_space<any>>
    %c0_i32_12 = arith.constant 0 : i32
    %29 = tpu.memref_slice %arg8[%c3_i32_10, %c0_i32_12] : memref<8x128xf32, #tpu.memory_space<vmem>> -> memref<1x128xf32, #tpu.memory_space<vmem>>
    %30 = tpu.memref_squeeze %29 : memref<1x128xf32, #tpu.memory_space<vmem>> -> memref<128xf32, #tpu.memory_space<vmem>>
    tpu.enqueue_dma source(%28 : memref<128xf32, #tpu.memory_space<any>>) target(%30 : memref<128xf32, #tpu.memory_space<vmem>>) target_semaphore(%arg9 : memref<!tpu.dma_semaphore, #tpu.memory_space<semaphore_mem>>)
    %c4_i32 = arith.constant 4 : i32
    %31 = arith.addi %2, %c4_i32 : i32
    %32 = arith.index_cast %31 : i32 to index
    %33 = memref.load %arg2[%32] : memref<16xi32, #tpu.memory_space<smem>>
    %c4_i32_13 = arith.constant 4 : i32
    %c0_i32_14 = arith.constant 0 : i32
    %34 = tpu.memref_slice %arg3[%33, %c0_i32_14] : memref<50x128xf32, #tpu.memory_space<any>> -> memref<1x128xf32, #tpu.memory_space<any>>
    %35 = tpu.memref_squeeze %34 : memref<1x128xf32, #tpu.memory_space<any>> -> memref<128xf32, #tpu.memory_space<any>>
    %c0_i32_15 = arith.constant 0 : i32
    %36 = tpu.memref_slice %arg8[%c4_i32_13, %c0_i32_15] : memref<8x128xf32, #tpu.memory_space<vmem>> -> memref<1x128xf32, #tpu.memory_space<vmem>>
    %37 = tpu.memref_squeeze %36 : memref<1x128xf32, #tpu.memory_space<vmem>> -> memref<128xf32, #tpu.memory_space<vmem>>
    tpu.enqueue_dma source(%35 : memref<128xf32, #tpu.memory_space<any>>) target(%37 : memref<128xf32, #tpu.memory_space<vmem>>) target_semaphore(%arg9 : memref<!tpu.dma_semaphore, #tpu.memory_space<semaphore_mem>>)
    %c5_i32 = arith.constant 5 : i32
    %38 = arith.addi %2, %c5_i32 : i32
    %39 = arith.index_cast %38 : i32 to index
    %40 = memref.load %arg2[%39] : memref<16xi32, #tpu.memory_space<smem>>
    %c5_i32_16 = arith.constant 5 : i32
    %c0_i32_17 = arith.constant 0 : i32
    %41 = tpu.memref_slice %arg3[%40, %c0_i32_17] : memref<50x128xf32, #tpu.memory_space<any>> -> memref<1x128xf32, #tpu.memory_space<any>>
    %42 = tpu.memref_squeeze %41 : memref<1x128xf32, #tpu.memory_space<any>> -> memref<128xf32, #tpu.memory_space<any>>
    %c0_i32_18 = arith.constant 0 : i32
    %43 = tpu.memref_slice %arg8[%c5_i32_16, %c0_i32_18] : memref<8x128xf32, #tpu.memory_space<vmem>> -> memref<1x128xf32, #tpu.memory_space<vmem>>
    %44 = tpu.memref_squeeze %43 : memref<1x128xf32, #tpu.memory_space<vmem>> -> memref<128xf32, #tpu.memory_space<vmem>>
    tpu.enqueue_dma source(%42 : memref<128xf32, #tpu.memory_space<any>>) target(%44 : memref<128xf32, #tpu.memory_space<vmem>>) target_semaphore(%arg9 : memref<!tpu.dma_semaphore, #tpu.memory_space<semaphore_mem>>)
    %c6_i32 = arith.constant 6 : i32
    %45 = arith.addi %2, %c6_i32 : i32
    %46 = arith.index_cast %45 : i32 to index
    %47 = memref.load %arg2[%46] : memref<16xi32, #tpu.memory_space<smem>>
    %c6_i32_19 = arith.constant 6 : i32
    %c0_i32_20 = arith.constant 0 : i32
    %48 = tpu.memref_slice %arg3[%47, %c0_i32_20] : memref<50x128xf32, #tpu.memory_space<any>> -> memref<1x128xf32, #tpu.memory_space<any>>
    %49 = tpu.memref_squeeze %48 : memref<1x128xf32, #tpu.memory_space<any>> -> memref<128xf32, #tpu.memory_space<any>>
    %c0_i32_21 = arith.constant 0 : i32
    %50 = tpu.memref_slice %arg8[%c6_i32_19, %c0_i32_21] : memref<8x128xf32, #tpu.memory_space<vmem>> -> memref<1x128xf32, #tpu.memory_space<vmem>>
    %51 = tpu.memref_squeeze %50 : memref<1x128xf32, #tpu.memory_space<vmem>> -> memref<128xf32, #tpu.memory_space<vmem>>
    tpu.enqueue_dma source(%49 : memref<128xf32, #tpu.memory_space<any>>) target(%51 : memref<128xf32, #tpu.memory_space<vmem>>) target_semaphore(%arg9 : memref<!tpu.dma_semaphore, #tpu.memory_space<semaphore_mem>>)
    %c7_i32 = arith.constant 7 : i32
    %52 = arith.addi %2, %c7_i32 : i32
    %53 = arith.index_cast %52 : i32 to index
    %54 = memref.load %arg2[%53] : memref<16xi32, #tpu.memory_space<smem>>
    %c7_i32_22 = arith.constant 7 : i32
    %c0_i32_23 = arith.constant 0 : i32
    %55 = tpu.memref_slice %arg3[%54, %c0_i32_23] : memref<50x128xf32, #tpu.memory_space<any>> -> memref<1x128xf32, #tpu.memory_space<any>>
    %56 = tpu.memref_squeeze %55 : memref<1x128xf32, #tpu.memory_space<any>> -> memref<128xf32, #tpu.memory_space<any>>
    %c0_i32_24 = arith.constant 0 : i32
    %57 = tpu.memref_slice %arg8[%c7_i32_22, %c0_i32_24] : memref<8x128xf32, #tpu.memory_space<vmem>> -> memref<1x128xf32, #tpu.memory_space<vmem>>
    %58 = tpu.memref_squeeze %57 : memref<1x128xf32, #tpu.memory_space<vmem>> -> memref<128xf32, #tpu.memory_space<vmem>>
    tpu.enqueue_dma source(%56 : memref<128xf32, #tpu.memory_space<any>>) target(%58 : memref<128xf32, #tpu.memory_space<vmem>>) target_semaphore(%arg9 : memref<!tpu.dma_semaphore, #tpu.memory_space<semaphore_mem>>)
    %c0_i32_25 = arith.constant 0 : i32
    %c0_i32_26 = arith.constant 0 : i32
    %59 = tpu.memref_slice %arg3[%5, %c0_i32_26] : memref<50x128xf32, #tpu.memory_space<any>> -> memref<1x128xf32, #tpu.memory_space<any>>
    %60 = tpu.memref_squeeze %59 : memref<1x128xf32, #tpu.memory_space<any>> -> memref<128xf32, #tpu.memory_space<any>>
    %c0_i32_27 = arith.constant 0 : i32
    %61 = tpu.memref_slice %arg8[%c0_i32_25, %c0_i32_27] : memref<8x128xf32, #tpu.memory_space<vmem>> -> memref<1x128xf32, #tpu.memory_space<vmem>>
    %62 = tpu.memref_squeeze %61 : memref<1x128xf32, #tpu.memory_space<vmem>> -> memref<128xf32, #tpu.memory_space<vmem>>
    tpu.wait_dma2 semaphore(%arg9 : memref<!tpu.dma_semaphore, #tpu.memory_space<semaphore_mem>>) src(%60 : memref<128xf32, #tpu.memory_space<any>>) dst(%62 : memref<128xf32, #tpu.memory_space<vmem>>)
    %c1_i32_28 = arith.constant 1 : i32
    %c0_i32_29 = arith.constant 0 : i32
    %63 = tpu.memref_slice %arg3[%12, %c0_i32_29] : memref<50x128xf32, #tpu.memory_space<any>> -> memref<1x128xf32, #tpu.memory_space<any>>
    %64 = tpu.memref_squeeze %63 : memref<1x128xf32, #tpu.memory_space<any>> -> memref<128xf32, #tpu.memory_space<any>>
    %c0_i32_30 = arith.constant 0 : i32
    %65 = tpu.memref_slice %arg8[%c1_i32_28, %c0_i32_30] : memref<8x128xf32, #tpu.memory_space<vmem>> -> memref<1x128xf32, #tpu.memory_space<vmem>>
    %66 = tpu.memref_squeeze %65 : memref<1x128xf32, #tpu.memory_space<vmem>> -> memref<128xf32, #tpu.memory_space<vmem>>
    tpu.wait_dma2 semaphore(%arg9 : memref<!tpu.dma_semaphore, #tpu.memory_space<semaphore_mem>>) src(%64 : memref<128xf32, #tpu.memory_space<any>>) dst(%66 : memref<128xf32, #tpu.memory_space<vmem>>)
    %c2_i32_31 = arith.constant 2 : i32
    %c0_i32_32 = arith.constant 0 : i32
    %67 = tpu.memref_slice %arg3[%19, %c0_i32_32] : memref<50x128xf32, #tpu.memory_space<any>> -> memref<1x128xf32, #tpu.memory_space<any>>
    %68 = tpu.memref_squeeze %67 : memref<1x128xf32, #tpu.memory_space<any>> -> memref<128xf32, #tpu.memory_space<any>>
    %c0_i32_33 = arith.constant 0 : i32
    %69 = tpu.memref_slice %arg8[%c2_i32_31, %c0_i32_33] : memref<8x128xf32, #tpu.memory_space<vmem>> -> memref<1x128xf32, #tpu.memory_space<vmem>>
    %70 = tpu.memref_squeeze %69 : memref<1x128xf32, #tpu.memory_space<vmem>> -> memref<128xf32, #tpu.memory_space<vmem>>
    tpu.wait_dma2 semaphore(%arg9 : memref<!tpu.dma_semaphore, #tpu.memory_space<semaphore_mem>>) src(%68 : memref<128xf32, #tpu.memory_space<any>>) dst(%70 : memref<128xf32, #tpu.memory_space<vmem>>)
    %c3_i32_34 = arith.constant 3 : i32
    %c0_i32_35 = arith.constant 0 : i32
    %71 = tpu.memref_slice %arg3[%26, %c0_i32_35] : memref<50x128xf32, #tpu.memory_space<any>> -> memref<1x128xf32, #tpu.memory_space<any>>
    %72 = tpu.memref_squeeze %71 : memref<1x128xf32, #tpu.memory_space<any>> -> memref<128xf32, #tpu.memory_space<any>>
    %c0_i32_36 = arith.constant 0 : i32
    %73 = tpu.memref_slice %arg8[%c3_i32_34, %c0_i32_36] : memref<8x128xf32, #tpu.memory_space<vmem>> -> memref<1x128xf32, #tpu.memory_space<vmem>>
    %74 = tpu.memref_squeeze %73 : memref<1x128xf32, #tpu.memory_space<vmem>> -> memref<128xf32, #tpu.memory_space<vmem>>
    tpu.wait_dma2 semaphore(%arg9 : memref<!tpu.dma_semaphore, #tpu.memory_space<semaphore_mem>>) src(%72 : memref<128xf32, #tpu.memory_space<any>>) dst(%74 : memref<128xf32, #tpu.memory_space<vmem>>)
    %c4_i32_37 = arith.constant 4 : i32
    %c0_i32_38 = arith.constant 0 : i32
    %75 = tpu.memref_slice %arg3[%33, %c0_i32_38] : memref<50x128xf32, #tpu.memory_space<any>> -> memref<1x128xf32, #tpu.memory_space<any>>
    %76 = tpu.memref_squeeze %75 : memref<1x128xf32, #tpu.memory_space<any>> -> memref<128xf32, #tpu.memory_space<any>>
    %c0_i32_39 = arith.constant 0 : i32
    %77 = tpu.memref_slice %arg8[%c4_i32_37, %c0_i32_39] : memref<8x128xf32, #tpu.memory_space<vmem>> -> memref<1x128xf32, #tpu.memory_space<vmem>>
    %78 = tpu.memref_squeeze %77 : memref<1x128xf32, #tpu.memory_space<vmem>> -> memref<128xf32, #tpu.memory_space<vmem>>
    tpu.wait_dma2 semaphore(%arg9 : memref<!tpu.dma_semaphore, #tpu.memory_space<semaphore_mem>>) src(%76 : memref<128xf32, #tpu.memory_space<any>>) dst(%78 : memref<128xf32, #tpu.memory_space<vmem>>)
    %c5_i32_40 = arith.constant 5 : i32
    %c0_i32_41 = arith.constant 0 : i32
    %79 = tpu.memref_slice %arg3[%40, %c0_i32_41] : memref<50x128xf32, #tpu.memory_space<any>> -> memref<1x128xf32, #tpu.memory_space<any>>
    %80 = tpu.memref_squeeze %79 : memref<1x128xf32, #tpu.memory_space<any>> -> memref<128xf32, #tpu.memory_space<any>>
    %c0_i32_42 = arith.constant 0 : i32
    %81 = tpu.memref_slice %arg8[%c5_i32_40, %c0_i32_42] : memref<8x128xf32, #tpu.memory_space<vmem>> -> memref<1x128xf32, #tpu.memory_space<vmem>>
    %82 = tpu.memref_squeeze %81 : memref<1x128xf32, #tpu.memory_space<vmem>> -> memref<128xf32, #tpu.memory_space<vmem>>
    tpu.wait_dma2 semaphore(%arg9 : memref<!tpu.dma_semaphore, #tpu.memory_space<semaphore_mem>>) src(%80 : memref<128xf32, #tpu.memory_space<any>>) dst(%82 : memref<128xf32, #tpu.memory_space<vmem>>)
    %c6_i32_43 = arith.constant 6 : i32
    %c0_i32_44 = arith.constant 0 : i32
    %83 = tpu.memref_slice %arg3[%47, %c0_i32_44] : memref<50x128xf32, #tpu.memory_space<any>> -> memref<1x128xf32, #tpu.memory_space<any>>
    %84 = tpu.memref_squeeze %83 : memref<1x128xf32, #tpu.memory_space<any>> -> memref<128xf32, #tpu.memory_space<any>>
    %c0_i32_45 = arith.constant 0 : i32
    %85 = tpu.memref_slice %arg8[%c6_i32_43, %c0_i32_45] : memref<8x128xf32, #tpu.memory_space<vmem>> -> memref<1x128xf32, #tpu.memory_space<vmem>>
    %86 = tpu.memref_squeeze %85 : memref<1x128xf32, #tpu.memory_space<vmem>> -> memref<128xf32, #tpu.memory_space<vmem>>
    tpu.wait_dma2 semaphore(%arg9 : memref<!tpu.dma_semaphore, #tpu.memory_space<semaphore_mem>>) src(%84 : memref<128xf32, #tpu.memory_space<any>>) dst(%86 : memref<128xf32, #tpu.memory_space<vmem>>)
    %c7_i32_46 = arith.constant 7 : i32
    %c0_i32_47 = arith.constant 0 : i32
    %87 = tpu.memref_slice %arg3[%54, %c0_i32_47] : memref<50x128xf32, #tpu.memory_space<any>> -> memref<1x128xf32, #tpu.memory_space<any>>
    %88 = tpu.memref_squeeze %87 : memref<1x128xf32, #tpu.memory_space<any>> -> memref<128xf32, #tpu.memory_space<any>>
    %c0_i32_48 = arith.constant 0 : i32
    %89 = tpu.memref_slice %arg8[%c7_i32_46, %c0_i32_48] : memref<8x128xf32, #tpu.memory_space<vmem>> -> memref<1x128xf32, #tpu.memory_space<vmem>>
    %90 = tpu.memref_squeeze %89 : memref<1x128xf32, #tpu.memory_space<vmem>> -> memref<128xf32, #tpu.memory_space<vmem>>
    tpu.wait_dma2 semaphore(%arg9 : memref<!tpu.dma_semaphore, #tpu.memory_space<semaphore_mem>>) src(%88 : memref<128xf32, #tpu.memory_space<any>>) dst(%90 : memref<128xf32, #tpu.memory_space<vmem>>)
    %c8_i32_49 = arith.constant 8 : i32
    %91 = arith.muli %arg1, %c8_i32_49 : i32
    %92 = tpu.assume_multiple %91, 8 : i32
    %93 = arith.index_cast %92 : i32 to index
    %c0 = arith.constant 0 : index
    %94 = vector.load %arg4[%93, %c0] : memref<8x128xf32, #tpu.memory_space<vmem>>, vector<8x128xf32>
    %c0_50 = arith.constant 0 : index
    %c0_51 = arith.constant 0 : index
    %95 = vector.load %arg8[%c0_50, %c0_51] : memref<8x128xf32, #tpu.memory_space<vmem>>, vector<8x128xf32>
    %96 = arith.addf %95, %94 : vector<8x128xf32>
    %cst = arith.constant dense<0.000000e+00> : vector<8xf32>
    %97 = vector.multi_reduction <add>, %96, %cst [1] : vector<8x128xf32> to vector<8xf32>
    %98 = vector.shape_cast %97 : vector<8xf32> to vector<8x1xf32>
    %cst_52 = arith.constant 1.280000e+02 : f32
    %99 = vector.broadcast %cst_52 : f32 to vector<8x1xf32>
    %100 = arith.divf %98, %99 : vector<8x1xf32>
    %101 = vector.broadcast %100 : vector<8x1xf32> to vector<8x128xf32>
    %102 = arith.subf %96, %101 : vector<8x128xf32>
    %103 = arith.mulf %102, %102 : vector<8x128xf32>
    %cst_53 = arith.constant dense<0.000000e+00> : vector<8xf32>
    %104 = vector.multi_reduction <add>, %103, %cst_53 [1] : vector<8x128xf32> to vector<8xf32>
    %105 = vector.shape_cast %104 : vector<8xf32> to vector<8x1xf32>
    %cst_54 = arith.constant 1.280000e+02 : f32
    %106 = vector.broadcast %cst_54 : f32 to vector<8x1xf32>
    %107 = arith.divf %105, %106 : vector<8x1xf32>
    %cst_55 = arith.constant 9.99999974E-6 : f32
    %108 = vector.broadcast %cst_55 : f32 to vector<8x1xf32>
    %109 = arith.addf %107, %108 : vector<8x1xf32>
    %110 = math.rsqrt %109 : vector<8x1xf32>
    %111 = vector.broadcast %110 : vector<8x1xf32> to vector<8x128xf32>
    %112 = arith.mulf %102, %111 : vector<8x128xf32>
    %c0_56 = arith.constant 0 : index
    %c0_57 = arith.constant 0 : index
    %113 = vector.load %arg5[%c0_56, %c0_57] : memref<1x128xf32, #tpu.memory_space<vmem>>, vector<1x128xf32>
    %114 = vector.broadcast %113 : vector<1x128xf32> to vector<8x128xf32>
    %115 = arith.mulf %112, %114 : vector<8x128xf32>
    %c0_58 = arith.constant 0 : index
    %c0_59 = arith.constant 0 : index
    %116 = vector.load %arg6[%c0_58, %c0_59] : memref<1x128xf32, #tpu.memory_space<vmem>>, vector<1x128xf32>
    %117 = vector.broadcast %116 : vector<1x128xf32> to vector<8x128xf32>
    %118 = arith.addf %115, %117 : vector<8x128xf32>
    %c0_60 = arith.constant 0 : index
    %c0_61 = arith.constant 0 : index
    %c0_62 = arith.constant 0 : index
    %119 = vector.load %arg7[%c0_60, %c0_61, %c0_62] : memref<1x8x128xf32, #tpu.memory_space<vmem>>, vector<1x8x128xf32>
    %120 = vector.shape_cast %119 : vector<1x8x128xf32> to vector<8x128xf32>
    %121 = vector.shape_cast %118 : vector<8x128xf32> to vector<1x8x128xf32>
    tpu.vector_store %arg7[%c0_60, %c0_61, %c0_62], %121 {strides = array<i32>} : memref<1x8x128xf32, #tpu.memory_space<vmem>>, vector<1x8x128xf32>,
    return
  }
  func.func @transform_1(%arg0: i32, %arg1: i32, %arg2: memref<16xi32, #tpu.memory_space<smem>>) -> (i32, i32) {
    %c0_i32 = arith.constant 0 : i32
    %c0_i32_0 = arith.constant 0 : i32
    %c0_i32_1 = arith.constant 0 : i32
    return %c0_i32, %c0_i32_0 : i32, i32
  }
  func.func @transform_2(%arg0: i32, %arg1: i32, %arg2: memref<16xi32, #tpu.memory_space<smem>>) -> (i32, i32) {
    %c0_i32 = arith.constant 0 : i32
    %c0_i32_0 = arith.constant 0 : i32
    %c0_i32_1 = arith.constant 0 : i32
    return %c0_i32, %c0_i32_0 : i32, i32
  }
  func.func @transform_3(%arg0: i32, %arg1: i32, %arg2: memref<16xi32, #tpu.memory_space<smem>>) -> (i32, i32) {
    %c0_i32 = arith.constant 0 : i32
    %c0_i32_0 = arith.constant 0 : i32
    %c0_i32_1 = arith.constant 0 : i32
    return %c0_i32, %c0_i32_0 : i32, i32
  }
  func.func @transform_4(%arg0: i32, %arg1: i32, %arg2: memref<16xi32, #tpu.memory_space<smem>>) -> (i32, i32, i32) {
    %c0_i32 = arith.constant 0 : i32
    %c0_i32_0 = arith.constant 0 : i32
    return %arg0, %arg1, %c0_i32 : i32, i32, i32
  }
}

</mosaic_0001>

<bundles_post_ra>
// kernel: tpu_custom_call.1
= control target key start
LH: loop header
LB: loop body
LE: loop exit
PB: predicated region body
PF: predicated region fallthrough
CT: control target
= control target key end

     0   :  { %s1223_s0 = inlined_call_operand.hbm [shape: s32[16], index: 0, kind: input, shape index: {}]   ;;  %s1224_s1 = inlined_call_operand.hbm [shape: f32[50,128], index: 1, kind: input, shape index: {}]   ;;  %s1225_s2 = inlined_call_operand.hbm [shape: f32[8,128], index: 2, kind: input, shape index: {}]   ;;  %s1226_s3 = inlined_call_operand.vmem [shape: f32[1,128], index: 3, kind: input, shape index: {}]   ;;  %s1227_s4 = inlined_call_operand.vmem [shape: f32[1,128], index: 4, kind: input, shape index: {}]   ;;  %s1228_s5 = inlined_call_operand.hbm [shape: f32[2,8,128], index: 5, kind: output, shape index: {}]  }
   0x1   :  { %1237 = sst [smem:[#allocation36_spill]] %s1225_s2  ;;  %s567_s20 = scalar_lea.hbm %s1223_s0, 16 }
   0x2   :  { %p568_p0 = scmp.ne.s32.totalorder %s1223_s0, %s567_s20  ;;  %p571_p1 = scmp.lt.u32.totalorder %s567_s20, %s1223_s0 }
   0x4   :  { %p573_p2 = pnand %p571_p1, %p568_p0 }
   0x6   :  { %576 = shalt.err (!%p573_p2)  }
   0x7   :  { %s885_s25 = smov [#allocation5]  }
   0x8   :  { %11 = dma.hbm_to_smem %s1223_s0, 16, %s885_s25, [#allocation4] }
   0x9   :  { %849 = dma.done.wait [#allocation4], 16 }
   0xa   :  { %850 = vsyncadd [#allocation4], 4294967280 }
   0xb   :  { %13 = sfence }
   0xc   :  { %14 = vsyncpa [#allocation7], 0 }
   0xd   :  { %15 = vsyncpa [#allocation8], 0 }
   0xe   :  { %17 = vsyncpa [#allocation8 + $0x1], 0  ;;  %s938_s28 = smov 0   ;;  %s940_s29 = smov 0  }
   0xf   :  { %s942_s30 = smov 0   ;;  %s944_s6 = smov 0  }
  0x10   :  { %s946_s7 = smov 0   ;;  %s948_s8 = smov 0  }
  0x11 LB: > { %1238 = sst [smem:[#allocation32_spill]] %s871_s30  ;;  %s467_s0 = sadd.s32 4294967295, %s883_s8   ;;  %s883_s8 = sphi %s948_s8, %s23_s8   ;;  %s879_s7 = sphi %s946_s7, %s1256_s7   ;;  %s875_s6 = sphi %s944_s6, %s1255_s6   ;;  %s871_s30 = sphi %s942_s30, %s1254_s30   ;;  %s867_s29 = sphi %s940_s29, %s1258_s29   ;;  %s863_s28 = sphi %s938_s28, %s1257_s28  }
  0x12   : > { %1239 = sst [smem:[#allocation33_spill]] %s879_s7  ;;  %s468_s9 = sadd.s32 4294967294, %s883_s8  }
  0x13   : > { %s35_s10 = sadd.s32 1, %s879_s7  ;;  %s107_s11 = sadd.s32 1, %s871_s30 }
  0x14   : > { %p37_p3 = scmp.ge.s32.totalorder %s35_s10, 2  ;;  %p117_p4 = scmp.ne.s32.totalorder %s871_s30, %s867_s29 }
  0x15   : > { %p118_p5 = scmp.eq.s32.totalorder %s467_s0, 1  ;;  %p123_p6 = scmp.ne.s32.totalorder %s867_s29, %s863_s28 }
  0x16   : > { %s1260_s10 = smov (%p37_p3, %s35_s10), 0  ;;  %p124_p8 = scmp.eq.s32.totalorder %s468_s9, 1 }
  0x17   : > { %1240 = sst [smem:[#allocation34_spill]] %s1260_s10  ;;  %p978_p7 = por %p118_p5, %p117_p4 }
  0x18   : > { %s102_s13 = ssub.s32 %s879_s7, %s1260_s10  ;;  %p469_p9 = scmp.ge.s32.totalorder %s883_s8, 1 }
  0x19   : > { %s1241_s12 = scalar_select %p978_p7, 1, 0 }
  0x1a   : > { %p105_p10 = scmp.eq.s32.totalorder %s102_s13, 0  ;;  %p985_p11 = por %p124_p8, %p123_p6 }
  0x1b   : > { %p131_p12 = scmp.lt.s32.totalorder %s883_s8, 3  ;;  %p997_p0 = scmp.eq.s32.totalorder %s467_s0, 0 }
  0x1c   : > { %s1242_s14 = scalar_select %p985_p11, 1, 0 }
  0x1d   : > { %s991_s15 = scalar_select %p105_p10, %s871_s30, %s107_s11  }
  0x1e   : > { %p993_p13 = pnand %p469_p9, %p131_p12  ;;  %s886_s18 = smov [#allocation6]  }
  0x1f   : > { %1243 = sst [smem:[#allocation35_spill]] %s991_s15  ;;  %s144_s19 = sshll.u32 %s886_s18, 4  ;;  %s145_s19 = int_to_ptr.vmem [resolvable:$true] %s144_s19 }
  0x20   : > { %s1244_s16 = scalar_select %p993_p13, 1, 0 }
  0x21   : > { %s1245_s17 = scalar_select %p997_p0, 1, 0 }
  0x22   : > { %p496_p1 = pneg %p993_p13  ;;  %s1247_s2 = sld [smem:[#allocation36_spill]] }
  0x24   : > { %p1005_p2 = pnand %p997_p0, %p496_p1 }
  0x26   : > { %p579_p4 = pneg %p1005_p2 }
  0x28   : > { %s577_s23 = scalar_lea.hbm %s1247_s2, 128 }
  0x29   : > { %p578_p3 = scmp.ne.s32.totalorder %s1247_s2, %s577_s23  ;;  %p584_p8 = scmp.lt.u32.totalorder %s577_s23, %s1247_s2 }
  0x2b   : > { %p580_p5 = pnand %p579_p4, %p578_p3 }
  0x2d   : > { %p581_p6 = pneg %p580_p5 }
  0x2f   : > { %p586_p9 = pnand %p584_p8, %p581_p6 }
  0x31   : > { %589 = shalt.err (!%p586_p9)
}
  0x32   : > { %s590_s0 = scalar_lea.vmem %s145_s19, 128  ;;  %p598_p11 = scmp.lt.s32.totalorder %s145_s19, %s145_s19 }
  0x33   : > { %p591_p10 = scmp.ne.s32.totalorder %s145_s19, %s590_s0  ;;  %p599_p7 = scmp.lt.s32.totalorder %s590_s0, %s590_s0 }
  0x35   : > { %p593_p12 = pnand %p591_p10, %p579_p4  ;;  %p600_p0 = por %p599_p7, %p598_p11 }
  0x37   : > { %p594_p1 = pneg %p593_p12 }
  0x39   : > { %p601_p13 = pnand %p600_p0, %p594_p1 }
  0x3b   : > { %604 = shalt.err (!%p601_p13)
}
  0x3c   : > { %499 = dma.hbm_to_vmem [thread:$0]  (!%p1005_p2), %s1247_s2, 128, %s145_s19, [#allocation7]  }
  0x3d   : > { %p1248_p3 = scmp.ne.s32.totalorder %s1244_s16, 0 }
  0x3e   : > { %p1249_p5 = scmp.ne.s32.totalorder (!%p1248_p3), %s1245_s17, 0 }
  0x3f   : > { %163 = sbr.rel (%p1248_p3) target bundleno = 582 (0x246), region = 32 }
  0x46   : > { %852 = dma.done.wait (%p1249_p5), [#allocation7], 128  }
  0x47   : > { %854 = vsyncadd (%p1249_p5), [#allocation7], 4294967168  ;;  %s1233_s13 = sand.u32 1, %s867_s29   ;;  %s1033_s18 = sshll.u32 %s875_s6, 3 }
  0x48   : > { %s1037_s19 = sshll.u32 %s1233_s13, 3  ;;  %s185_s16 = sld [smem:[#allocation5 + %s1033_s18]] }
  0x49   : > { %s887_s20 = smov [#allocation2]   ;;  %s199_s22 = sadd.s32 1, %s1033_s18 }
  0x4a   : > { %s195_s21 = sshll.u32 %s887_s20, 4  ;;  %s1043_s17 = sld [smem:[#allocation5 + %s199_s22]]  ;;  %s1041_s21 = int_to_ptr.vmem [resolvable:$true] %s195_s21 }
  0x4b   : > { %s215_s23 = sadd.s32 2, %s1033_s18  ;;  %s888_s24 = smov [#allocation2 + $0x1]  }
  0x4c   : > { %s211_s25 = sshll.u32 %s888_s24, 4  ;;  %s1046_s26 = sld [smem:[#allocation5 + %s215_s23]]  ;;  %s1048_s25 = int_to_ptr.vmem [resolvable:$true] %s211_s25 }
  0x4d   : > { %s1056_s10 = scalar_lea.hbm %s1224_s1, 896 }
  0x4e   : > { %s475_s27 = sshll.u32 %s185_s16, 4 }
  0x4f   : > { %s187_s11 = scalar_lea.hbm %s1224_s1, %s475_s27 }
  0x50   : > { %s605_s13 = scalar_lea.hbm %s187_s11, 16  ;;  %p608_p11 = scmp.lt.u32.totalorder %s187_s11, %s1224_s1 }
  0x51   : > { %p606_p7 = scmp.ne.s32.totalorder %s187_s11, %s605_s13  ;;  %p609_p13 = scmp.lt.u32.totalorder %s1056_s10, %s605_s13 }
  0x52   : > { %p611_p2 = scmp.lt.u32.totalorder %s605_s13, %s187_s11 }
  0x53   : > { %p610_p0 = por %p609_p13, %p608_p11 }
  0x55   : > { %p612_p4 = por %p611_p2, %p610_p0 }
  0x57   : > { %p613_p6 = pnand %p612_p4, %p606_p7 }
  0x59   : > { %616 = shalt.err (!%p613_p6)  }
  0x5a   : > { %s617_s16 = scalar_lea.vmem %s1041_s21, 16  ;;  %s1065_s2 = scalar_lea.vmem %s1041_s21, 128 }
  0x5b   : > { %p618_p8 = scmp.ne.s32.totalorder %s1041_s21, %s617_s16  ;;  %p622_p9 = scmp.lt.s32.totalorder %s1041_s21, %s1041_s21 }
  0x5c   : > { %p623_p10 = scmp.lt.s32.totalorder %s1065_s2, %s617_s16 }
  0x5e   : > { %p624_p12 = por %p623_p10, %p622_p9 }
  0x60   : > { %p625_p1 = pnand %p624_p12, %p618_p8 }
  0x62   : > { %628 = shalt.err (!%p625_p1)  }
  0x63   : > { %198 = dma.hbm_to_vmem [thread:$0]  %s187_s11, 16, %s1041_s21, [#allocation3] }
  0x64   : > { %s476_s7 = sshll.u32 %s1043_s17, 4  ;;  %s889_s13 = smov [#allocation2 + $0x2]  }
  0x65   : > { %s227_s23 = sshll.u32 %s889_s13, 4  ;;  %s202_s0 = scalar_lea.hbm %s1224_s1, %s476_s7  ;;  %s1075_s23 = int_to_ptr.vmem [resolvable:$true] %s227_s23 }
  0x66   : > { %s629_s9 = scalar_lea.hbm %s202_s0, 16  ;;  %p632_p5 = scmp.lt.u32.totalorder %s202_s0, %s1224_s1 }
  0x67   : > { %p630_p3 = scmp.ne.s32.totalorder %s202_s0, %s629_s9  ;;  %p633_p7 = scmp.lt.u32.totalorder %s1056_s10, %s629_s9 }
  0x68   : > { %p635_p13 = scmp.lt.u32.totalorder %s629_s9, %s202_s0 }
  0x69   : > { %p634_p11 = por %p633_p7, %p632_p5 }
  0x6b   : > { %p636_p0 = por %p635_p13, %p634_p11 }
  0x6d   : > { %p637_p2 = pnand %p636_p0, %p630_p3 }
  0x6f   : > { %640 = shalt.err (!%p637_p2)  }
  0x70   : > { %s641_s17 = scalar_lea.vmem %s1048_s25, 16  ;;  %p646_p6 = scmp.lt.s32.totalorder %s1048_s25, %s1041_s21 }
  0x71   : > { %p642_p4 = scmp.ne.s32.totalorder %s1048_s25, %s641_s17  ;;  %p647_p8 = scmp.lt.s32.totalorder %s1065_s2, %s641_s17 }
  0x73   : > { %p648_p9 = por %p647_p8, %p646_p6 }
  0x75   : > { %p649_p10 = pnand %p648_p9, %p642_p4 }
  0x77   : > { %652 = shalt.err (!%p649_p10)  }
  0x78   : > { %214 = dma.hbm_to_vmem [thread:$0]  %s202_s0, 16, %s1048_s25, [#allocation3] }
  0x79   : > { %s477_s11 = sshll.u32 %s1046_s26, 4  ;;  %s231_s16 = sadd.s32 3, %s1033_s18 }
  0x7a   : > { %s218_s24 = scalar_lea.hbm %s1224_s1, %s477_s11  ;;  %s1092_s27 = sld [smem:[#allocation5 + %s231_s16]] }
  0x7b   : > { %s653_s9 = scalar_lea.hbm %s218_s24, 16  ;;  %p656_p1 = scmp.lt.u32.totalorder %s218_s24, %s1224_s1 }
  0x7c   : > { %p654_p12 = scmp.ne.s32.totalorder %s218_s24, %s653_s9  ;;  %p657_p3 = scmp.lt.u32.totalorder %s1056_s10, %s653_s9 }
  0x7d   : > { %p659_p7 = scmp.lt.u32.totalorder %s653_s9, %s218_s24 }
  0x7e   : > { %p658_p5 = por %p657_p3, %p656_p1 }
  0x80   : > { %p660_p11 = por %p659_p7, %p658_p5 }
  0x82   : > { %p661_p13 = pnand %p660_p11, %p654_p12 }
  0x84   : > { %664 = shalt.err (!%p661_p13)  }
  0x85   : > { %s665_s25 = scalar_lea.vmem %s1075_s23, 16  ;;  %p670_p2 = scmp.lt.s32.totalorder %s1075_s23, %s1041_s21 }
  0x86   : > { %p666_p0 = scmp.ne.s32.totalorder %s1075_s23, %s665_s25  ;;  %p671_p4 = scmp.lt.s32.totalorder %s1065_s2, %s665_s25 }
  0x88   : > { %p672_p6 = por %p671_p4, %p670_p2 }
  0x8a   : > { %p673_p8 = pnand %p672_p6, %p666_p0 }
  0x8c   : > { %676 = shalt.err (!%p673_p8)  }
  0x8d   : > { %230 = dma.hbm_to_vmem [thread:$0]  %s218_s24, 16, %s1075_s23, [#allocation3] }
  0x8e   : > { %s247_s26 = sadd.s32 4, %s1033_s18  ;;  %s890_s0 = smov [#allocation2 + $0x3]  }
  0x8f   : > { %s243_s17 = sshll.u32 %s890_s0, 4  ;;  %s248_s11 = sld [smem:[#allocation5 + %s247_s26]]  ;;  %s244_s17 = int_to_ptr.vmem [resolvable:$true] %s243_s17 }
  0x90   : > { %s891_s16 = smov [#allocation2 + $0x4]   ;;  %s263_s13 = sadd.s32 5, %s1033_s18 }
  0x91   : > { %s259_s7 = sshll.u32 %s891_s16, 4  ;;  %s478_s9 = sshll.u32 %s1092_s27, 4  ;;  %s1107_s7 = int_to_ptr.vmem [resolvable:$true] %s259_s7 }
  0x92   : > { %s234_s25 = scalar_lea.hbm %s1224_s1, %s478_s9  ;;  %s1112_s15 = sld [smem:[#allocation5 + %s263_s13]] }
  0x93   : > { %s677_s30 = scalar_lea.hbm %s234_s25, 16  ;;  %p680_p10 = scmp.lt.u32.totalorder %s234_s25, %s1224_s1 }
  0x94   : > { %p678_p9 = scmp.ne.s32.totalorder %s234_s25, %s677_s30  ;;  %p681_p12 = scmp.lt.u32.totalorder %s1056_s10, %s677_s30 }
  0x95   : > { %p683_p3 = scmp.lt.u32.totalorder %s677_s30, %s234_s25 }
  0x96   : > { %p682_p1 = por %p681_p12, %p680_p10 }
  0x98   : > { %p684_p5 = por %p683_p3, %p682_p1 }
  0x9a   : > { %p685_p7 = pnand %p684_p5, %p678_p9 }
  0x9c   : > { %688 = shalt.err (!%p685_p7)  }
  0x9d   : > { %s689_s27 = scalar_lea.vmem %s244_s17, 16  ;;  %p694_p13 = scmp.lt.s32.totalorder %s244_s17, %s1041_s21 }
  0x9e   : > { %p690_p11 = scmp.ne.s32.totalorder %s244_s17, %s689_s27  ;;  %p695_p0 = scmp.lt.s32.totalorder %s1065_s2, %s689_s27 }
  0xa0   : > { %p696_p2 = por %p695_p0, %p694_p13 }
  0xa2   : > { %p697_p4 = pnand %p696_p2, %p690_p11 }
  0xa4   : > { %700 = shalt.err (!%p697_p4)  }
  0xa5   : > { %246 = dma.hbm_to_vmem [thread:$0]  %s234_s25, 16, %s244_s17, [#allocation3] }
  0xa6   : > { %s479_s26 = sshll.u32 %s248_s11, 4  ;;  %s892_s30 = smov [#allocation2 + $0x5]  }
  0xa7   : > { %s250_s13 = scalar_lea.hbm %s1224_s1, %s479_s26  ;;  %s275_s9 = sshll.u32 %s892_s30, 4  ;;  %s276_s9 = int_to_ptr.vmem [resolvable:$true] %s275_s9 }
  0xa8   : > { %s701_s20 = scalar_lea.hbm %s250_s13, 16  ;;  %p704_p8 = scmp.lt.u32.totalorder %s250_s13, %s1224_s1 }
  0xa9   : > { %p702_p6 = scmp.ne.s32.totalorder %s250_s13, %s701_s20  ;;  %p705_p9 = scmp.lt.u32.totalorder %s1056_s10, %s701_s20 }
  0xaa   : > { %p707_p12 = scmp.lt.u32.totalorder %s701_s20, %s250_s13 }
  0xab   : > { %p706_p10 = por %p705_p9, %p704_p8 }
  0xad   : > { %p708_p1 = por %p707_p12, %p706_p10 }
  0xaf   : > { %p709_p3 = pnand %p708_p1, %p702_p6 }
  0xb1   : > { %712 = shalt.err (!%p709_p3)  }
  0xb2   : > { %s713_s17 = scalar_lea.vmem %s1107_s7, 16  ;;  %p718_p7 = scmp.lt.s32.totalorder %s1107_s7, %s1041_s21 }
  0xb3   : > { %p714_p5 = scmp.ne.s32.totalorder %s1107_s7, %s713_s17  ;;  %p719_p11 = scmp.lt.s32.totalorder %s1065_s2, %s713_s17 }
  0xb5   : > { %p720_p13 = por %p719_p11, %p718_p7 }
  0xb7   : > { %p721_p0 = pnand %p720_p13, %p714_p5 }
  0xb9   : > { %724 = shalt.err (!%p721_p0)  }
  0xba   : > { %262 = dma.hbm_to_vmem [thread:$0]  %s250_s13, 16, %s1107_s7, [#allocation3] }
  0xbb   : > { %s279_s11 = sadd.s32 6, %s1033_s18  ;;  %s480_s25 = sshll.u32 %s1112_s15, 4 }
  0xbc   : > { %s280_s24 = sld [smem:[#allocation5 + %s279_s11]]  ;;  %s266_s0 = scalar_lea.hbm %s1224_s1, %s480_s25 }
  0xbd   : > { %s725_s16 = scalar_lea.hbm %s266_s0, 16  ;;  %p728_p4 = scmp.lt.u32.totalorder %s266_s0, %s1224_s1 }
  0xbe   : > { %p726_p2 = scmp.ne.s32.totalorder %s266_s0, %s725_s16  ;;  %p729_p6 = scmp.lt.u32.totalorder %s1056_s10, %s725_s16 }
  0xbf   : > { %p731_p9 = scmp.lt.u32.totalorder %s725_s16, %s266_s0 }
  0xc0   : > { %p730_p8 = por %p729_p6, %p728_p4 }
  0xc2   : > { %p732_p10 = por %p731_p9, %p730_p8 }
  0xc4   : > { %p733_p12 = pnand %p732_p10, %p726_p2 }
  0xc6   : > { %736 = shalt.err (!%p733_p12)  }
  0xc7   : > { %s737_s7 = scalar_lea.vmem %s276_s9, 16  ;;  %p742_p3 = scmp.lt.s32.totalorder %s276_s9, %s1041_s21 }
  0xc8   : > { %p738_p1 = scmp.ne.s32.totalorder %s276_s9, %s737_s7  ;;  %p743_p5 = scmp.lt.s32.totalorder %s1065_s2, %s737_s7 }
  0xca   : > { %p744_p7 = por %p743_p5, %p742_p3 }
  0xcc   : > { %p745_p11 = pnand %p744_p7, %p738_p1 }
  0xce   : > { %748 = shalt.err (!%p745_p11)  }
  0xcf   : > { %278 = dma.hbm_to_vmem [thread:$0]  %s266_s0, 16, %s276_s9, [#allocation3] }
  0xd0   : > { %s893_s15 = smov [#allocation2 + $0x6]   ;;  %s295_s22 = sadd.s32 7, %s1033_s18 }
  0xd1   : > { %s291_s13 = sshll.u32 %s893_s15, 4  ;;  %s296_s23 = sld [smem:[#allocation5 + %s295_s22]]  ;;  %s292_s13 = int_to_ptr.vmem [resolvable:$true] %s291_s13 }
  0xd2   : > { %s481_s17 = sshll.u32 %s280_s24, 4  ;;  %s894_s11 = smov [#allocation2 + $0x7]  }
  0xd3   : > { %s307_s25 = sshll.u32 %s894_s11, 4  ;;  %s282_s16 = scalar_lea.hbm %s1224_s1, %s481_s17  ;;  %s308_s25 = int_to_ptr.vmem [resolvable:$true] %s307_s25 }
  0xd4   : > { %s749_s30 = scalar_lea.hbm %s282_s16, 16  ;;  %p752_p0 = scmp.lt.u32.totalorder %s282_s16, %s1224_s1 }
  0xd5   : > { %p750_p13 = scmp.ne.s32.totalorder %s282_s16, %s749_s30  ;;  %p753_p2 = scmp.lt.u32.totalorder %s1056_s10, %s749_s30 }
  0xd6   : > { %p755_p6 = scmp.lt.u32.totalorder %s749_s30, %s282_s16 }
  0xd7   : > { %p754_p4 = por %p753_p2, %p752_p0 }
  0xd9   : > { %p756_p8 = por %p755_p6, %p754_p4 }
  0xdb   : > { %p757_p9 = pnand %p756_p8, %p750_p13 }
  0xdd   : > { %760 = shalt.err (!%p757_p9)  }
  0xde   : > { %s761_s18 = scalar_lea.vmem %s292_s13, 16  ;;  %p766_p12 = scmp.lt.s32.totalorder %s292_s13, %s1041_s21 }
  0xdf   : > { %p762_p10 = scmp.ne.s32.totalorder %s292_s13, %s761_s18  ;;  %p767_p1 = scmp.lt.s32.totalorder %s1065_s2, %s761_s18 }
  0xe1   : > { %p768_p3 = por %p767_p1, %p766_p12 }
  0xe3   : > { %p769_p5 = pnand %p768_p3, %p762_p10 }
  0xe5   : > { %772 = shalt.err (!%p769_p5)  }
  0xe6   : > { %294 = dma.hbm_to_vmem [thread:$0]  %s282_s16, 16, %s292_s13, [#allocation3] }
  0xe7   : > { %s482_s9 = sshll.u32 %s296_s23, 4 }
  0xe8   : > { %s298_s15 = scalar_lea.hbm %s1224_s1, %s482_s9 }
  0xe9   : > { %s773_s22 = scalar_lea.hbm %s298_s15, 16  ;;  %p776_p11 = scmp.lt.u32.totalorder %s298_s15, %s1224_s1 }
  0xea   : > { %p774_p7 = scmp.ne.s32.totalorder %s298_s15, %s773_s22  ;;  %p777_p13 = scmp.lt.u32.totalorder %s1056_s10, %s773_s22 }
  0xeb   : > { %p779_p2 = scmp.lt.u32.totalorder %s773_s22, %s298_s15 }
  0xec   : > { %p778_p0 = por %p777_p13, %p776_p11 }
  0xee   : > { %p780_p4 = por %p779_p2, %p778_p0 }
  0xf0   : > { %p781_p6 = pnand %p780_p4, %p774_p7 }
  0xf2   : > { %784 = shalt.err (!%p781_p6)  }
  0xf3   : > { %s785_s13 = scalar_lea.vmem %s308_s25, 16  ;;  %p790_p9 = scmp.lt.s32.totalorder %s308_s25, %s1041_s21 }
  0xf4   : > { %p786_p8 = scmp.ne.s32.totalorder %s308_s25, %s785_s13  ;;  %p791_p10 = scmp.lt.s32.totalorder %s1065_s2, %s785_s13 }
  0xf6   : > { %p792_p12 = por %p791_p10, %p790_p9 }
  0xf8   : > { %p793_p1 = pnand %p792_p12, %p786_p8 }
  0xfa   : > { %796 = shalt.err (!%p793_p1)  }
  0xfb   : > { %310 = dma.hbm_to_vmem [thread:$0]  %s298_s15, 16, %s308_s25, [#allocation3] }
  0xfc   : > { %s181_s23 = scalar_lea.vmem [#allocation9], %s1037_s19 }
  0xfd   : > { %855 = dma.done.wait [#allocation3], 128 }
  0xfe   : > { %856 = vsyncadd [#allocation3], 4294967168  ;;  %v328_v0 = vld [vmem:[#allocation6] sm:$0xff]  ;;  %v329_v1 = vld [vmem:[#allocation2] sm:$0xff]  ;;  %s486_s25 = sshll.u32 %s875_s6, 7  ;;  %s375_s27 = sshll.u32 %s181_s23, 4  ;;  %s1176_s27 = int_to_ptr.vmem [resolvable:$true] %s375_s27 }
  0xff   : > { %v330_v2 = vadd.f32 %v329_v1, %v328_v0  ;;  %v483_v11 = vld [vmem:[%s1226_s3] ss:$0 sm:$0xff]  ;;  %s1174_s30 = scalar_lea.hbm %s1228_s5, %s486_s25  ;;  %s1250_s20 = sand.u32 1, %s867_s29  }
 0x100   : > { %v484_v13 = vld [vmem:[%s1227_s4] ss:$0 sm:$0xff]  ;;  %s361_s7 = scalar_lea.sflag [#allocation8], %s1250_s20  ;;  %s797_s18 = scalar_lea.vmem %s1176_s27, 128 }
 0x101   : > { %331 = vadd.xlane.f32.xlu0 %v330_v2  ;;  %p798_p3 = scmp.ne.s32.totalorder %s1176_s27, %s797_s18  ;;  %p1251_p5 = scmp.ne.s32.totalorder %s1241_s12, 0 }
 0x102   : > { %s895_s6 = smov [#allocation9]  }
 0x103   : > { %p799_p7 = pnand %p798_p3, %p1251_p5  ;;  %s801_s9 = sshll.u32 %s895_s6, 4  ;;  %s802_s9 = int_to_ptr.vmem [resolvable:$false] %s801_s9 }
 0x104   : > { %s803_s24 = scalar_lea.vmem %s802_s9, 256  ;;  %p804_p13 = scmp.lt.s32.totalorder %s1176_s27, %s802_s9 }
 0x105   : > { %p800_p11 = pneg %p799_p7  ;;  %p805_p0 = scmp.lt.s32.totalorder %s803_s24, %s797_s18 }
 0x107   : > { %p806_p2 = por %p805_p0, %p804_p13 }
 0x109   : > { %p807_p4 = pnand %p806_p2, %p800_p11 }
 0x18e   : > { %v332_v3 = vpop.xlane.xlu0 %331 }
 0x18f   : > { %v334_v4 = vmul.f32 0.0078125, %v332_v3 }
 0x191   : > { %v335_v5 = vsub.f32 %v330_v2, %v334_v4 }
 0x193   : > { %v336_v6 = vmul.f32 %v335_v5, %v335_v5 }
 0x195   : > { %337 = vadd.xlane.f32.xlu0 %v336_v6 }
 0x222   : > { %v338_v7 = vpop.xlane.xlu0 %337 }
 0x223   : > { %v339_v8 = vmul.f32 0.0078125, %v338_v7 }
 0x225   : > { %v340_v9 = vadd.f32 1e-05, %v339_v8 }
 0x227   : > { %565 = vrsqrt.f32 %v340_v9 }
 0x231   : > { %v566_v10 = vpop.eup %565 }
 0x232   : > { %v342_v12 = vmul.f32 %v566_v10, %v335_v5 }
 0x234   : > { %v350_v14 = vmul.f32 %v483_v11, %v342_v12 }
 0x236   : > { %v358_v15 = vadd.f32 %v484_v13, %v350_v14 }
 0x238   : > { %359 = vst [vmem:[%s181_s23] sm:$0xff] %v358_v15 }
 0x239   : > { %810 = shalt.err (!%p807_p4)
}
 0x23a   : > { %s811_s0 = scalar_lea.hbm %s1174_s30, 128  ;;  %s815_s17 = scalar_lea.hbm %s1228_s5, 256 }
 0x23b   : > { %p812_p6 = scmp.ne.s32.totalorder %s1174_s30, %s811_s0  ;;  %p816_p10 = scmp.lt.u32.totalorder %s1174_s30, %s1228_s5 }
 0x23c   : > { %p817_p12 = scmp.lt.u32.totalorder %s815_s17, %s811_s0  ;;  %p819_p3 = scmp.lt.u32.totalorder %s811_s0, %s1174_s30 }
 0x23d   : > { %p813_p8 = pnand %p812_p6, %p1251_p5 }
 0x23e   : > { %p818_p1 = por %p817_p12, %p816_p10 }
 0x23f   : > { %p814_p9 = pneg %p813_p8 }
 0x240   : > { %p820_p7 = por %p819_p3, %p818_p1 }
 0x242   : > { %p821_p11 = pnand %p820_p7, %p814_p9 }
 0x244   : > { %824 = shalt.err (!%p821_p11)
}
 0x245   : > { %494 = dma.vmem_to_hbm [thread:$0]  (%p1251_p5), %s1176_s27, 128, %s1174_s30, %s361_s7  }
 0x246 PF: > { %p506_p13 = scmp.ge.s32.totalorder %s883_s8, 2  ;;  %s387_s23 = sand.u32 1, %s863_s28  }
 0x247   : > { %p1252_p0 = scmp.ne.s32.totalorder %s1242_s14, 0  ;;  %s388_s10 = scalar_lea.sflag [#allocation8], %s387_s23 }
 0x249   : > { %p501_p2 = pnand %p506_p13, %p1252_p0 }
 0x24b   : > { %858 = dma.done.wait (!%p501_p2), %s388_s10, 128  }
 0x24c   : > { %860 = vsyncadd (!%p501_p2), %s388_s10, 4294967168  ;;  %s23_s8 = sadd.s32 1, %s883_s8   ;;  %s1253_s19 = sld [smem:[#allocation32_spill]] }
 0x24d   : > { %p20_p4 = scmp.ge.s32.totalorder %s23_s8, 4   ;;  %s1254_s30 = sld [smem:[#allocation35_spill]] }
 0x24e   : > { %s1255_s6 = sld [smem:[#allocation33_spill]]  ;;  %s1256_s7 = sld [smem:[#allocation34_spill]] }
 0x24f   : > { %s1257_s28 = smov %s867_s29  ;;  %22 = sbr.rel (!%p20_p4) target bundleno = 17 (0x11), region = 117 }
 0x252   : > { %s1258_s29 = smov %s1253_s19 }
 0x256   :  { %393 = vsyncpa [#allocation7], 1 }
 0x257   :  { %395 = vsyncpa [#allocation7 + $0x1], 1 }
 0x258   :  { %396 = vsyncpa [#allocation8], 1 }
 0x259   :  { %398 = vsyncpa [#allocation8 + $0x1], 1 }
 0x25a   :  { %399 = vsyncmov [#allocation3] }
 0x25d   :  { %s400_s12 = vpop.sfrf %399 }
 0x25e   :  { %p489_p5 = scmp.ne.s32.totalorder %s400_s12, 0 }
 0x260   :  { %404 = shalt.err (%p489_p5)  }

</bundles_post_ra>
